<compile_context>
chip_gen: v7x
topology: tpu7x:2x2x1
jax: 0.10.0
libtpu: 0.0.40
codegen_flags: <defaults>
</compile_context>

<pallas_src>
import jax
import jax.numpy as jnp
from jax import lax
from jax.experimental import pallas as pl
from jax.experimental.pallas import tpu as pltpu

_EPS = 1e-12  # matches the tiny eps ATen adds to the squared magnitudes


def _make_kernel(margin, n_queries):
    inv_n = 1.0 / float(n_queries)
    margin = float(margin)

    def kernel(m_ref, q_ref, lab_ref, out_ref, pos_acc, neg_acc):
        step = pl.program_id(0)

        @pl.when(step == 0)
        def _():
            pos_acc[...] = jnp.zeros_like(pos_acc)
            neg_acc[...] = jnp.zeros_like(neg_acc)

        m = m_ref[...]        # (M, D)  gallery embeddings (resident)
        q = q_ref[...]        # (TQ, D) query tile
        lab = lab_ref[...]    # (TQ, M) label tile (one-hot-ish, float)

        tq = q.shape[0]
        mm = m.shape[0]

        # scores_t[i, j] = <q_i, m_j>  == (m @ q.T).T restricted to this tile.
        # Contracting dims (1,1): MXU consumes the RHS transposed natively.
        scores_t = lax.dot_general(
            q, m, dimension_numbers=(((1,), (1,)), ((), ())),
            preferred_element_type=jnp.float32)                       # (TQ, M)

        # Row norms.  q: lane reduce to (TQ,1).  m: ones @ (m*m) with contracting
        # dims (1,1) gives a lane-oriented (1, M) row without any relayout.
        q_norm2 = jnp.sum(q * q, axis=1, keepdims=True)               # (TQ, 1)
        ones_row = jnp.ones((1, q.shape[1]), jnp.float32)
        m_norm2 = lax.dot_general(
            ones_row, m * m, dimension_numbers=(((1,), (1,)), ((), ())),
            preferred_element_type=jnp.float32)                       # (1, M)

        inv_q = lax.rsqrt(q_norm2 + _EPS)                             # (TQ, 1)
        inv_m = lax.rsqrt(m_norm2 + _EPS)                             # (1, M)
        cos = scores_t * inv_q * inv_m                                # (TQ, M)

        col = lax.broadcasted_iota(jnp.int32, (tq, mm), 1).astype(jnp.float32)
        big = jnp.float32(mm)   # sentinel > any valid column index

        # --- positive pair: m[argmax(labels, dim=1)], first max on ties ---
        lab_max = jnp.max(lab, axis=1, keepdims=True)
        pos_idx = jnp.min(jnp.where(lab == lab_max, col, big),
                          axis=1, keepdims=True)                      # (TQ, 1)
        pos_cos = jnp.sum(jnp.where(col == pos_idx, cos, 0.0),
                          axis=1, keepdims=True)                      # (TQ, 1)
        pos_loss = 1.0 - pos_cos                                      # target = +1

        # --- hardest negative: argmax over masked raw scores ---
        neg_mask = jnp.where(lab != 0, 0.0, 1.0)                      # ~labels.bool()
        nms = scores_t * neg_mask
        nms = jnp.where(nms == 0.0, -jnp.inf, nms)                    # zero -> -inf
        nms_max = jnp.max(nms, axis=1, keepdims=True)
        neg_idx = jnp.min(jnp.where(nms == nms_max, col, big),
                          axis=1, keepdims=True)                      # (TQ, 1)
        neg_cos = jnp.sum(jnp.where(col == neg_idx, cos, 0.0),
                          axis=1, keepdims=True)                      # (TQ, 1)
        neg_loss = jnp.maximum(0.0, neg_cos - margin)                 # target = -1

        pos_acc[...] += jnp.sum(pos_loss, axis=0, keepdims=True)      # (1, 1)
        neg_acc[...] += jnp.sum(neg_loss, axis=0, keepdims=True)      # (1, 1)

        @pl.when(step == pl.num_programs(0) - 1)
        def _():
            # loss = (mean(pos) + mean(neg)) / 2, mean over the TRUE query count.
            out_ref[...] = 0.5 * (pos_acc[...] + neg_acc[...]) * inv_n

    return kernel


def _pick_query_tile(n):
    for t in (512, 256, 128, 64, 32, 16, 8):
        if n % t == 0:
            return t
    return n  # fall back to the full extent (block == full dim is always legal)


def triploss3_hete_cosine(m, q, labels, margin=0.2):
    """m: (M, D), q: (N, D) or (N, 1, D), labels: (N, M) -> scalar f32 loss."""
    q = jnp.squeeze(q)
    m = jnp.asarray(m, jnp.float32)
    q = jnp.asarray(q, jnp.float32)
    labels = jnp.asarray(labels, jnp.float32)

    n, d = q.shape
    mm, dm = m.shape
    assert d == dm and labels.shape == (n, mm)

    tq = _pick_query_tile(n)
    grid = (n // tq,)
    kernel = _make_kernel(margin, n)

    # TODO(synk): gallery (M) axis is kept fully resident in VMEM; add an online
    # row-max over M-tiles if the gallery ever outgrows VMEM.
    out = pl.pallas_call(
        kernel,
        out_shape=jax.ShapeDtypeStruct((1, 1), jnp.float32),
        grid_spec=pltpu.PrefetchScalarGridSpec(
            num_scalar_prefetch=0,
            grid=grid,
            in_specs=[
                pl.BlockSpec((mm, d), lambda i: (0, 0)),   # m: resident across steps
                pl.BlockSpec((tq, d), lambda i: (i, 0)),   # q: query tile
                pl.BlockSpec((tq, mm), lambda i: (i, 0)),  # labels: query tile
            ],
            out_specs=pl.BlockSpec((1, 1), lambda i: (0, 0)),
            scratch_shapes=[
                pltpu.VMEM((1, 1), jnp.float32),           # sum of positive losses
                pltpu.VMEM((1, 1), jnp.float32),           # sum of negative losses
            ],
        ),
        compiler_params=pltpu.CompilerParams(
            dimension_semantics=("arbitrary",),            # reduction axis (resident out)
            vmem_limit_bytes=32 * 1024 * 1024,
        ),
    )(m, q, labels)
    return out[0, 0]


def _reference(m, q, labels, margin=0.2):
    """Pure-JAX mirror of the PyTorch forward."""
    q = jnp.squeeze(q).astype(jnp.float32)
    m = m.astype(jnp.float32)
    scores = m @ q.T                      # (M, N)
    st = scores.T                         # (N, M)
    q_norm2 = jnp.sum(q * q, axis=1)
    m_norm2 = jnp.sum(m * m, axis=1)
    cos = st * lax.rsqrt(q_norm2 + _EPS)[:, None] * lax.rsqrt(m_norm2 + _EPS)[None, :]

    pos_idx = jnp.argmax(labels, axis=1)
    neg_mask = (labels == 0).astype(jnp.float32)
    nms = st * neg_mask
    nms = jnp.where(nms == 0.0, -jnp.inf, nms)
    neg_idx = jnp.argmax(nms, axis=1)

    rows = jnp.arange(q.shape[0])
    pos_loss = jnp.mean(1.0 - cos[rows, pos_idx])
    neg_loss = jnp.mean(jnp.maximum(0.0, cos[rows, neg_idx] - margin))
    return 0.5 * (pos_loss + neg_loss)


if __name__ == "__main__":
    key = jax.random.PRNGKey(0)
    k1, k2, k3 = jax.random.split(key, 3)
    M, N, D = 8, 8, 128                      # gallery size, query count, embed dim
    m = jax.random.normal(k1, (M, D), dtype=jnp.float32)
    q = jax.random.normal(k2, (N, 1, D), dtype=jnp.float32)   # extra dim -> squeeze()
    pos_ids = jax.random.randint(k3, (N,), 0, M)
    labels = jax.nn.one_hot(pos_ids, M, dtype=jnp.float32)    # (N, M) one-hot

    loss = triploss3_hete_cosine(m, q, labels, margin=0.2)
    jax.block_until_ready(loss)

    ref = _reference(m, q, labels, margin=0.2)
    assert jnp.allclose(loss, ref, atol=1e-4, rtol=1e-4), (loss, ref)
    print("KERNEL_OK")
</pallas_src>

<mosaic_0001>
module attributes {stable_mosaic.version = 11 : i64} {
  func.func @kernel(%arg0: i32, %arg1: memref<8x128xf32, #tpu.memory_space<vmem>>, %arg2: memref<8x128xf32, #tpu.memory_space<vmem>>, %arg3: memref<8x8xf32, #tpu.memory_space<vmem>>, %arg4: memref<1x1xf32, #tpu.memory_space<vmem>>, %arg5: memref<1x1xf32, #tpu.memory_space<vmem>>, %arg6: memref<1x1xf32, #tpu.memory_space<vmem>>) attributes {dimension_semantics = [#tpu.dimension_semantics<arbitrary>], iteration_bounds = array<i64: 1>, scalar_prefetch = 0 : i64, scratch_operands = 2 : i64, tpu.core_type = #tpu.core_type<tc>, window_params = [{pipeline_mode = #tpu.pipeline_mode<synchronous>, transform_indices = @transform_0, window_bounds = array<i64: 8, 128>}, {transform_indices = @transform_1, window_bounds = array<i64: 8, 128>}, {transform_indices = @transform_2, window_bounds = array<i64: 8, 8>}, {pipeline_mode = #tpu.pipeline_mode<synchronous>, transform_indices = @transform_3, window_bounds = array<i64: 1, 1>}]} {
    %c0_i32 = arith.constant 0 : i32
    %0 = arith.cmpi eq, %arg0, %c0_i32 : i32
    %1 = arith.extui %0 : i1 to i32
    %c0_i32_0 = arith.constant 0 : i32
    %2 = arith.cmpi ne, %1, %c0_i32_0 : i32
    scf.if %2 {
      %cst_41 = arith.constant 0.000000e+00 : f32
      %82 = vector.broadcast %cst_41 : f32 to vector<1x1xf32>
      %c0_42 = arith.constant 0 : index
      %c0_43 = arith.constant 0 : index
      %83 = vector.load %arg5[%c0_42, %c0_43] : memref<1x1xf32, #tpu.memory_space<vmem>>, vector<1x1xf32>
      tpu.vector_store %arg5[%c0_42, %c0_43], %82 {strides = array<i32>} : memref<1x1xf32, #tpu.memory_space<vmem>>, vector<1x1xf32>,
      %cst_44 = arith.constant 0.000000e+00 : f32
      %84 = vector.broadcast %cst_44 : f32 to vector<1x1xf32>
      %c0_45 = arith.constant 0 : index
      %c0_46 = arith.constant 0 : index
      %85 = vector.load %arg6[%c0_45, %c0_46] : memref<1x1xf32, #tpu.memory_space<vmem>>, vector<1x1xf32>
      tpu.vector_store %arg6[%c0_45, %c0_46], %84 {strides = array<i32>} : memref<1x1xf32, #tpu.memory_space<vmem>>, vector<1x1xf32>,
    } else {
    }
    %c0 = arith.constant 0 : index
    %c0_1 = arith.constant 0 : index
    %3 = vector.load %arg1[%c0, %c0_1] : memref<8x128xf32, #tpu.memory_space<vmem>>, vector<8x128xf32>
    %c0_2 = arith.constant 0 : index
    %c0_3 = arith.constant 0 : index
    %4 = vector.load %arg2[%c0_2, %c0_3] : memref<8x128xf32, #tpu.memory_space<vmem>>, vector<8x128xf32>
    %c0_4 = arith.constant 0 : index
    %c0_5 = arith.constant 0 : index
    %5 = vector.load %arg3[%c0_4, %c0_5] : memref<8x8xf32, #tpu.memory_space<vmem>>, vector<8x8xf32>
    %cst = arith.constant dense<0.000000e+00> : vector<8x8xf32>
    %6 = tpu.matmul %4, %3, %cst {dimension_numbers = #tpu.dot_dimension_numbers<[1], [1], [0], [0], [0, 0, 1, 0], [], []>} : vector<8x128xf32>, vector<8x128xf32>, vector<8x8xf32> -> vector<8x8xf32>
    %7 = arith.mulf %4, %4 : vector<8x128xf32>
    %cst_6 = arith.constant dense<0.000000e+00> : vector<8xf32>
    %8 = vector.multi_reduction <add>, %7, %cst_6 [1] : vector<8x128xf32> to vector<8xf32>
    %9 = vector.shape_cast %8 : vector<8xf32> to vector<8x1xf32>
    %cst_7 = arith.constant 1.000000e+00 : f32
    %10 = vector.broadcast %cst_7 : f32 to vector<1x128xf32>
    %11 = arith.mulf %3, %3 : vector<8x128xf32>
    %cst_8 = arith.constant dense<0.000000e+00> : vector<1x8xf32>
    %12 = tpu.matmul %10, %11, %cst_8 {dimension_numbers = #tpu.dot_dimension_numbers<[1], [1], [0], [0], [0, 0, 1, 0], [], []>} : vector<1x128xf32>, vector<8x128xf32>, vector<1x8xf32> -> vector<1x8xf32>
    %cst_9 = arith.constant 9.99999996E-13 : f32
    %13 = vector.broadcast %cst_9 : f32 to vector<8x1xf32>
    %14 = arith.addf %9, %13 : vector<8x1xf32>
    %15 = math.rsqrt %14 : vector<8x1xf32>
    %cst_10 = arith.constant 9.99999996E-13 : f32
    %16 = vector.broadcast %cst_10 : f32 to vector<1x8xf32>
    %17 = arith.addf %12, %16 : vector<1x8xf32>
    %18 = math.rsqrt %17 : vector<1x8xf32>
    %19 = vector.broadcast %15 : vector<8x1xf32> to vector<8x8xf32>
    %20 = arith.mulf %6, %19 : vector<8x8xf32>
    %21 = vector.broadcast %18 : vector<1x8xf32> to vector<8x8xf32>
    %22 = arith.mulf %20, %21 : vector<8x8xf32>
    %23 = tpu.iota {dimensions = array<i32: 1>} : vector<8x8xi32>
    %24 = arith.sitofp %23 : vector<8x8xi32> to vector<8x8xf32>
    %cst_11 = arith.constant dense<0xFF800000> : vector<8xf32>
    %25 = vector.multi_reduction <maximumf>, %5, %cst_11 [1] : vector<8x8xf32> to vector<8xf32>
    %26 = vector.shape_cast %25 : vector<8xf32> to vector<8x1xf32>
    %27 = vector.broadcast %26 : vector<8x1xf32> to vector<8x8xf32>
    %28 = arith.cmpf oeq, %5, %27 : vector<8x8xf32>
    %cst_12 = arith.constant 8.000000e+00 : f32
    %29 = vector.broadcast %cst_12 : f32 to vector<8x8xf32>
    %30 = arith.select %28, %24, %29 : vector<8x8xi1>, vector<8x8xf32>
    %cst_13 = arith.constant dense<0x7F800000> : vector<8xf32>
    %31 = vector.multi_reduction <minimumf>, %30, %cst_13 [1] : vector<8x8xf32> to vector<8xf32>
    %32 = vector.shape_cast %31 : vector<8xf32> to vector<8x1xf32>
    %33 = vector.broadcast %32 : vector<8x1xf32> to vector<8x8xf32>
    %34 = arith.cmpf oeq, %24, %33 : vector<8x8xf32>
    %cst_14 = arith.constant 0.000000e+00 : f32
    %35 = vector.broadcast %cst_14 : f32 to vector<8x8xf32>
    %36 = arith.select %34, %22, %35 : vector<8x8xi1>, vector<8x8xf32>
    %cst_15 = arith.constant dense<0.000000e+00> : vector<8xf32>
    %37 = vector.multi_reduction <add>, %36, %cst_15 [1] : vector<8x8xf32> to vector<8xf32>
    %38 = vector.shape_cast %37 : vector<8xf32> to vector<8x1xf32>
    %cst_16 = arith.constant 1.000000e+00 : f32
    %39 = vector.broadcast %cst_16 : f32 to vector<8x1xf32>
    %40 = arith.subf %39, %38 : vector<8x1xf32>
    %cst_17 = arith.constant 0.000000e+00 : f32
    %41 = vector.broadcast %cst_17 : f32 to vector<8x8xf32>
    %42 = arith.cmpf one, %5, %41 : vector<8x8xf32>
    %cst_18 = arith.constant 0.000000e+00 : f32
    %cst_19 = arith.constant 1.000000e+00 : f32
    %43 = vector.broadcast %cst_18 : f32 to vector<8x8xf32>
    %44 = vector.broadcast %cst_19 : f32 to vector<8x8xf32>
    %45 = arith.select %42, %43, %44 : vector<8x8xi1>, vector<8x8xf32>
    %46 = arith.mulf %6, %45 : vector<8x8xf32>
    %cst_20 = arith.constant 0.000000e+00 : f32
    %47 = vector.broadcast %cst_20 : f32 to vector<8x8xf32>
    %48 = arith.cmpf oeq, %46, %47 : vector<8x8xf32>
    %cst_21 = arith.constant 0xFF800000 : f32
    %49 = vector.broadcast %cst_21 : f32 to vector<8x8xf32>
    %50 = arith.select %48, %49, %46 : vector<8x8xi1>, vector<8x8xf32>
    %cst_22 = arith.constant dense<0xFF800000> : vector<8xf32>
    %51 = vector.multi_reduction <maximumf>, %50, %cst_22 [1] : vector<8x8xf32> to vector<8xf32>
    %52 = vector.shape_cast %51 : vector<8xf32> to vector<8x1xf32>
    %53 = vector.broadcast %52 : vector<8x1xf32> to vector<8x8xf32>
    %54 = arith.cmpf oeq, %50, %53 : vector<8x8xf32>
    %cst_23 = arith.constant 8.000000e+00 : f32
    %55 = vector.broadcast %cst_23 : f32 to vector<8x8xf32>
    %56 = arith.select %54, %24, %55 : vector<8x8xi1>, vector<8x8xf32>
    %cst_24 = arith.constant dense<0x7F800000> : vector<8xf32>
    %57 = vector.multi_reduction <minimumf>, %56, %cst_24 [1] : vector<8x8xf32> to vector<8xf32>
    %58 = vector.shape_cast %57 : vector<8xf32> to vector<8x1xf32>
    %59 = vector.broadcast %58 : vector<8x1xf32> to vector<8x8xf32>
    %60 = arith.cmpf oeq, %24, %59 : vector<8x8xf32>
    %cst_25 = arith.constant 0.000000e+00 : f32
    %61 = vector.broadcast %cst_25 : f32 to vector<8x8xf32>
    %62 = arith.select %60, %22, %61 : vector<8x8xi1>, vector<8x8xf32>
    %cst_26 = arith.constant dense<0.000000e+00> : vector<8xf32>
    %63 = vector.multi_reduction <add>, %62, %cst_26 [1] : vector<8x8xf32> to vector<8xf32>
    %64 = vector.shape_cast %63 : vector<8xf32> to vector<8x1xf32>
    %cst_27 = arith.constant 2.000000e-01 : f32
    %65 = vector.broadcast %cst_27 : f32 to vector<8x1xf32>
    %66 = arith.subf %64, %65 : vector<8x1xf32>
    %cst_28 = arith.constant 0.000000e+00 : f32
    %67 = vector.broadcast %cst_28 : f32 to vector<8x1xf32>
    %68 = arith.maximumf %67, %66 : vector<8x1xf32>
    %c0_29 = arith.constant 0 : index
    %c0_30 = arith.constant 0 : index
    %69 = vector.load %arg5[%c0_29, %c0_30] : memref<1x1xf32, #tpu.memory_space<vmem>>, vector<1x1xf32>
    %cst_31 = arith.constant dense<0.000000e+00> : vector<1xf32>
    %70 = vector.multi_reduction <add>, %40, %cst_31 [0] : vector<8x1xf32> to vector<1xf32>
    %71 = vector.shape_cast %70 : vector<1xf32> to vector<1x1xf32>
    %72 = arith.addf %69, %71 : vector<1x1xf32>
    %c0_32 = arith.constant 0 : index
    %c0_33 = arith.constant 0 : index
    %73 = vector.load %arg5[%c0_32, %c0_33] : memref<1x1xf32, #tpu.memory_space<vmem>>, vector<1x1xf32>
    tpu.vector_store %arg5[%c0_32, %c0_33], %72 {strides = array<i32>} : memref<1x1xf32, #tpu.memory_space<vmem>>, vector<1x1xf32>,
    %c0_34 = arith.constant 0 : index
    %c0_35 = arith.constant 0 : index
    %74 = vector.load %arg6[%c0_34, %c0_35] : memref<1x1xf32, #tpu.memory_space<vmem>>, vector<1x1xf32>
    %cst_36 = arith.constant dense<0.000000e+00> : vector<1xf32>
    %75 = vector.multi_reduction <add>, %68, %cst_36 [0] : vector<8x1xf32> to vector<1xf32>
    %76 = vector.shape_cast %75 : vector<1xf32> to vector<1x1xf32>
    %77 = arith.addf %74, %76 : vector<1x1xf32>
    %c0_37 = arith.constant 0 : index
    %c0_38 = arith.constant 0 : index
    %78 = vector.load %arg6[%c0_37, %c0_38] : memref<1x1xf32, #tpu.memory_space<vmem>>, vector<1x1xf32>
    tpu.vector_store %arg6[%c0_37, %c0_38], %77 {strides = array<i32>} : memref<1x1xf32, #tpu.memory_space<vmem>>, vector<1x1xf32>,
    %c0_i32_39 = arith.constant 0 : i32
    %79 = arith.cmpi eq, %arg0, %c0_i32_39 : i32
    %80 = arith.extui %79 : i1 to i32
    %c0_i32_40 = arith.constant 0 : i32
    %81 = arith.cmpi ne, %80, %c0_i32_40 : i32
    scf.if %81 {
      %c0_41 = arith.constant 0 : index
      %c0_42 = arith.constant 0 : index
      %82 = vector.load %arg5[%c0_41, %c0_42] : memref<1x1xf32, #tpu.memory_space<vmem>>, vector<1x1xf32>
      %c0_43 = arith.constant 0 : index
      %c0_44 = arith.constant 0 : index
      %83 = vector.load %arg6[%c0_43, %c0_44] : memref<1x1xf32, #tpu.memory_space<vmem>>, vector<1x1xf32>
      %84 = arith.addf %82, %83 : vector<1x1xf32>
      %cst_45 = arith.constant 5.000000e-01 : f32
      %85 = vector.broadcast %cst_45 : f32 to vector<1x1xf32>
      %86 = arith.mulf %85, %84 : vector<1x1xf32>
      %cst_46 = arith.constant 1.250000e-01 : f32
      %87 = vector.broadcast %cst_46 : f32 to vector<1x1xf32>
      %88 = arith.mulf %86, %87 : vector<1x1xf32>
      %c0_47 = arith.constant 0 : index
      %c0_48 = arith.constant 0 : index
      %89 = vector.load %arg4[%c0_47, %c0_48] : memref<1x1xf32, #tpu.memory_space<vmem>>, vector<1x1xf32>
      tpu.vector_store %arg4[%c0_47, %c0_48], %88 {strides = array<i32>} : memref<1x1xf32, #tpu.memory_space<vmem>>, vector<1x1xf32>,
    } else {
    }
    return
  }
  func.func @transform_0(%arg0: i32) -> (i32, i32) {
    %c0_i32 = arith.constant 0 : i32
    %c0_i32_0 = arith.constant 0 : i32
    %c0_i32_1 = arith.constant 0 : i32
    return %c0_i32, %c0_i32_0 : i32, i32
  }
  func.func @transform_1(%arg0: i32) -> (i32, i32) {
    %c0_i32 = arith.constant 0 : i32
    %c0_i32_0 = arith.constant 0 : i32
    return %arg0, %c0_i32 : i32, i32
  }
  func.func @transform_2(%arg0: i32) -> (i32, i32) {
    %c0_i32 = arith.constant 0 : i32
    %c0_i32_0 = arith.constant 0 : i32
    return %arg0, %c0_i32 : i32, i32
  }
  func.func @transform_3(%arg0: i32) -> (i32, i32) {
    %c0_i32 = arith.constant 0 : i32
    %c0_i32_0 = arith.constant 0 : i32
    %c0_i32_1 = arith.constant 0 : i32
    return %c0_i32, %c0_i32_0 : i32, i32
  }
}

</mosaic_0001>

<bundles_post_ra>
// kernel: tpu_custom_call.1
= control target key start
LH: loop header
LB: loop body
LE: loop exit
PB: predicated region body
PF: predicated region fallthrough
CT: control target
= control target key end

     0   :  { %8 = vsyncpa [#allocation5], 0  ;;  %s507_s0 = inlined_call_operand.hbm [shape: f32[8,128], index: 0, kind: input, shape index: {}]   ;;  %s508_s1 = inlined_call_operand.hbm [shape: f32[8,128], index: 1, kind: input, shape index: {}]   ;;  %s509_s2 = inlined_call_operand.hbm [shape: f32[8,8], index: 2, kind: input, shape index: {}]   ;;  %s510_s3 = inlined_call_operand.hbm [shape: f32[1,1], index: 3, kind: output, shape index: {}]  }
   0x1   :  { %9 = vsyncpa [#allocation8], 0 }
   0x2   :  { %10 = vsyncpa [#allocation6], 0  ;;  %s415_s12 = smov [#allocation7]   ;;  %s416_s14 = smov [#allocation4]  }
   0x3   :  { %s27_s13 = sshll.u32 %s415_s12, 4  ;;  %s17_s15 = sshll.u32 %s416_s14, 4  ;;  %s28_s13 = int_to_ptr.vmem [resolvable:$true] %s27_s13  ;;  %s18_s15 = int_to_ptr.vmem [resolvable:$true] %s17_s15 }
   0x4   :  { %s321_s18 = scalar_lea.hbm %s508_s1, 128 }
   0x5   :  { %p322_p0 = scmp.ne.s32.totalorder %s508_s1, %s321_s18  ;;  %p325_p1 = scmp.lt.u32.totalorder %s321_s18, %s508_s1 }
   0x7   :  { %p327_p2 = pnand %p325_p1, %p322_p0 }
   0x9   :  { %330 = shalt.err (!%p327_p2)
}
   0xa   :  { %s331_s23 = scalar_lea.vmem %s28_s13, 128  ;;  %p336_p4 = scmp.lt.s32.totalorder %s28_s13, %s28_s13 }
   0xb   :  { %p332_p3 = scmp.ne.s32.totalorder %s28_s13, %s331_s23  ;;  %p337_p5 = scmp.lt.s32.totalorder %s331_s23, %s331_s23 }
   0xd   :  { %p338_p6 = por %p337_p5, %p336_p4 }
   0xf   :  { %p339_p7 = pnand %p338_p6, %p332_p3 }
  0x11   :  { %342 = shalt.err (!%p339_p7)
}
  0x12   :  { %30 = dma.hbm_to_vmem [thread:$0]  %s508_s1, 128, %s28_s13, [#allocation8]  }
  0x13   :  { %s343_s28 = scalar_lea.hbm %s507_s0, 128 }
  0x14   :  { %p344_p8 = scmp.ne.s32.totalorder %s507_s0, %s343_s28  ;;  %p347_p9 = scmp.lt.u32.totalorder %s343_s28, %s507_s0 }
  0x16   :  { %p349_p10 = pnand %p347_p9, %p344_p8 }
  0x18   :  { %352 = shalt.err (!%p349_p10)
}
  0x19   :  { %s353_s6 = scalar_lea.vmem %s18_s15, 128  ;;  %p358_p12 = scmp.lt.s32.totalorder %s18_s15, %s18_s15 }
  0x1a   :  { %p354_p11 = scmp.ne.s32.totalorder %s18_s15, %s353_s6  ;;  %p359_p13 = scmp.lt.s32.totalorder %s353_s6, %s353_s6 }
  0x1c   :  { %p360_p0 = por %p359_p13, %p358_p12 }
  0x1e   :  { %p361_p1 = pnand %p360_p0, %p354_p11 }
  0x20   :  { %364 = shalt.err (!%p361_p1)
}
  0x21   :  { %20 = dma.hbm_to_vmem [thread:$0]  %s507_s0, 128, %s18_s15, [#allocation5]  }
  0x22   :  { %s417_s8 = smov [#allocation9]   ;;  %s365_s12 = scalar_lea.hbm %s509_s2, 128 }
  0x23   :  { %s37_s9 = sshll.u32 %s417_s8, 4  ;;  %p366_p2 = scmp.ne.s32.totalorder %s509_s2, %s365_s12  ;;  %s38_s9 = int_to_ptr.vmem [resolvable:$true] %s37_s9 }
  0x24   :  { %p369_p3 = scmp.lt.u32.totalorder %s365_s12, %s509_s2 }
  0x26   :  { %p371_p4 = pnand %p369_p3, %p366_p2 }
  0x28   :  { %374 = shalt.err (!%p371_p4)
}
  0x29   :  { %s375_s18 = scalar_lea.vmem %s38_s9, 128  ;;  %p380_p6 = scmp.lt.s32.totalorder %s38_s9, %s38_s9 }
  0x2a   :  { %p376_p5 = scmp.ne.s32.totalorder %s38_s9, %s375_s18  ;;  %p381_p7 = scmp.lt.s32.totalorder %s375_s18, %s375_s18 }
  0x2c   :  { %p382_p8 = por %p381_p7, %p380_p6 }
  0x2e   :  { %p383_p9 = pnand %p382_p8, %p376_p5 }
  0x30   :  { %386 = shalt.err (!%p383_p9)
}
  0x31   :  { %40 = dma.hbm_to_vmem [thread:$0]  %s509_s2, 128, %s38_s9, [#allocation8]  }
  0x32   :  { %409 = dma.done.wait [#allocation5], 128  }
  0x33   :  { %410 = vsyncadd [#allocation5], 4294967168 }
  0x34   :  { %411 = dma.done.wait [#allocation8], 256  }
  0x35   :  { %412 = vsyncadd [#allocation8], 4294967040  ;;  %v418_v0 = vmov 0.0   ;;  %vm419_vm0 = vmmov 0   ;;  %v57_v1 = vld [vmem:[#allocation4] sm:$0xff]  ;;  %v58_v2 = vld [vmem:[#allocation7] sm:$0xff]  ;;  %v208_v17 = vlaneseq }
  0x36   :  { %300 = vmatprep.subr.mxu0 %v418_v0  ;;  %305 = vmatprep.subr.mxu1 %v418_v0  ;;  %v133_v3 = vmul.f32 %v57_v1, %v57_v1  ;;  %v130_v4 = vmul.f32 %v58_v2, %v58_v2  ;;  %v420_v5 = vmov 1.0   ;;  %v59_v6 = vld [vmem:[#allocation9] sm:$0xff]  ;;  %vm216_vm2 = vcmask 64512   ;;  %s421_s2 = smov [#allocation10]  }
  0x37   :  { %302 = vmatprep.mubr.msk.f32.mxu0 %vm419_vm0, %v418_v0  ;;  %307 = vmatprep.mubr.msk.f32.mxu1 %vm419_vm0, %v418_v0  ;;  %vm231_vm1 = vcmp.ne.f32.partialorder %v59_v6, 0.0  ;;  %v217_v19 = vsel %vm216_vm2, %v59_v6, -inf  ;;  %v209_v20 = vshrl.u32 %v208_v17, 7  ;;  %v214_v27 = vand.u32 127, %v208_v17  ;;  %s285_s19 = sshll.u32 %s421_s2, 4  ;;  %s286_s19 = int_to_ptr.vmem [resolvable:$true] %s285_s19 }
  0x38   :  { %301 = vmatpush3.xpose.msra.mxu0 %v57_v1  ;;  %306 = vmatpush3.xpose.msra.mxu1 %v133_v3  ;;  %v232_v8 = vsel %vm231_vm1, 0.0, %v420_v5  ;;  %vm54_vm8 = vcmask 0   ;;  %s387_s20 = scalar_lea.vmem %s286_s19, 16  ;;  %s391_s21 = scalar_lea.vmem %s286_s19, 32 }
  0x39   :  { %131 = vadd.xlane.f32.xlu1 %v130_v4  ;;  %v210_v21 = vsub.s32 0, %v209_v20  ;;  %v215_v28 = vcvt.s32.f32 %v214_v27  ;;  %55 = vst.msk [vmem:[#allocation2] sm:$0x1] %vm54_vm8, %v418_v0  ;;  %56 = vst.msk [vmem:[#allocation3] sm:$0x1] %vm54_vm8, %v418_v0  ;;  %p388_p10 = scmp.ne.s32.totalorder %s286_s19, %s387_s20  ;;  %p392_p11 = scmp.lt.s32.totalorder %s286_s19, %s286_s19 }
  0x3a   :  { %p393_p12 = scmp.lt.s32.totalorder %s391_s21, %s387_s20 }
  0x3b   :  { %303 = vmatmul.mubr.f32.vlgmr.msra.gmra.mrb[0].mxu0 %v58_v2  ;;  %308 = vmatmul.mubr.f32.vlgmr.msra.gmra.mrb[0].mxu1 %v420_v5 }
  0x3c   :  { %p394_p13 = por %p393_p12, %p392_p11 }
  0x3e   :  { %p395_p0 = pnand %p394_p13, %p388_p10 }
  0x40   :  { %v261_v55 = vld [vmem:[#allocation3] sm:$0x1]  ;;  %v251_v58 = vld [vmem:[#allocation2] sm:$0x1] }
  0xc6   :  { %v132_v7 = vpop.xlane.xlu1 %131 }
  0xc7   :  { %v134_v9 = vadd.f32 1e-12, %v132_v7 }
  0xc9   :  { %317 = vrsqrt.f32 %v134_v9 }
  0xd3   :  { %v318_v22 = vpop.eup %317 }
 0x10e   :  { %v126_v10 = vpop.f32.mrb[0].mxu0  ;;  %v202_v13 = vpop.f32.mrb[0].mxu1 }
 0x10f   :  { %v233_v11 = vmul.f32 %v232_v8, %v126_v10  ;;  %v304_v12 = vpop.f32.mrb[1].mxu0  ;;  %v203_v14 = vadd.f32 1e-12, %v202_v13  ;;  %v309_v15 = vpop.f32.mrb[1].mxu1  ;;  %v207_v24 = vmul.f32 %v318_v22, %v126_v10 }
 0x111   :  { %vm234_vm3 = vcmp.eq.f32.partialorder %v233_v11, 0.0  ;;  %319 = vrsqrt.f32 %v203_v14 }
 0x112   :  { %v235_v16 = vsel %vm234_vm3, -inf, %v233_v11 }
 0x113   :  { %v236_v18 = vsel %vm216_vm2, %v235_v16, -inf }
 0x114   :  { %237 = vmax.xlane.f32.xlu0 %v236_v18 }
 0x118   :  { %218 = vmax.xlane.f32.xlu0 %v217_v19 }
 0x11b   :  { %v320_v23 = vpop.eup %319 }
 0x11c   :  { %v211_v25 = vrot.slane %v320_v23, %v210_v21 }
 0x11e   :  { %v212_v26 = vmul.f32 %v211_v25, %v207_v24 }
 0x1a1   :  { %v238_v29 = vpop.xlane.xlu0 %237 }
 0x1a2   :  { %vm239_vm4 = vcmp.eq.f32.partialorder %v235_v16, %v238_v29 }
 0x1a3   :  { %v240_v30 = vsel %vm239_vm4, %v215_v28, 8.0 }
 0x1a4   :  { %v241_v31 = vsel %vm216_vm2, %v240_v30, inf }
 0x1a5   :  { %242 = vmin.xlane.f32.xlu1 %v241_v31  ;;  %v219_v32 = vpop.xlane.xlu0 %218 }
 0x1a6   :  { %vm220_vm5 = vcmp.eq.f32.partialorder %v59_v6, %v219_v32 }
 0x1a7   :  { %v221_v33 = vsel %vm220_vm5, %v215_v28, 8.0 }
 0x1a8   :  { %v222_v34 = vsel %vm216_vm2, %v221_v33, inf }
 0x1a9   :  { %223 = vmin.xlane.f32.xlu0 %v222_v34 }
 0x232   :  { %v243_v35 = vpop.xlane.xlu1 %242 }
 0x233   :  { %vm244_vm6 = vcmp.eq.f32.partialorder %v215_v28, %v243_v35 }
 0x234   :  { %v245_v36 = vsel %vm244_vm6, %v212_v26, 0.0 }
 0x235   :  { %v246_v37 = vsel %vm216_vm2, %v245_v36, 0.0 }
 0x236   :  { %v224_v38 = vpop.xlane.xlu0 %223  ;;  %247 = vadd.xlane.f32.xlu1 %v246_v37 }
 0x237   :  { %vm225_vm7 = vcmp.eq.f32.partialorder %v215_v28, %v224_v38 }
 0x238   :  { %v226_v39 = vsel %vm225_vm7, %v212_v26, 0.0 }
 0x239   :  { %v227_v40 = vsel %vm216_vm2, %v226_v39, 0.0 }
 0x23a   :  { %228 = vadd.xlane.f32.xlu0 %v227_v40 }
 0x2c3   :  { %v248_v41 = vpop.xlane.xlu1 %247 }
 0x2c4   :  { %v295_v42 = vadd.f32 -0.2, %v248_v41 }
 0x2c6   :  { %v250_v43 = vmax.f32 %v295_v42, 0.0 }
 0x2c7   :  { %v229_v44 = vpop.xlane.xlu0 %228 }
 0x2c8   :  { %v262_v45 = vrot.slane %v250_v43, 4  ;;  %v230_v46 = vsub.f32 1.0, %v229_v44 }
 0x2ca   :  { %v263_v47 = vadd.f32 %v262_v45, %v250_v43  ;;  %v252_v48 = vrot.slane %v230_v46, 4 }
 0x2cc   :  { %v264_v49 = vrot.slane %v263_v47, 2  ;;  %v253_v50 = vadd.f32 %v252_v48, %v230_v46 }
 0x2ce   :  { %v265_v51 = vadd.f32 %v264_v49, %v263_v47  ;;  %v254_v52 = vrot.slane %v253_v50, 2 }
 0x2d0   :  { %v266_v53 = vrot.slane %v265_v51, 1  ;;  %v255_v54 = vadd.f32 %v254_v52, %v253_v50 }
 0x2d2   :  { %v267_v56 = vadd.f32 %v266_v53, %v265_v51  ;;  %v256_v57 = vrot.slane %v255_v54, 1 }
 0x2d4   :  { %v257_v59 = vadd.f32 %v256_v57, %v255_v54  ;;  %v268_v60 = vadd.f32 %v267_v56, %v261_v55 }
 0x2d6   :  { %v258_v61 = vadd.f32 %v257_v59, %v251_v58  ;;  %269 = vst.msk [vmem:[#allocation3] sm:$0x1] %vm54_vm8, %v268_v60 }
 0x2d8   :  { %260 = vst.msk [vmem:[#allocation2] sm:$0x1] %vm54_vm8, %v258_v61 }
 0x2dd   :  { %v274_v63 = vld [vmem:[#allocation3] sm:$0x1] }
 0x2df   :  { %v273_v62 = vld [vmem:[#allocation2] sm:$0x1] }
 0x2e0   :  { %v275_v0 = vadd.f32 %v274_v63, %v273_v62 }
 0x2e2   :  { %v276_v1 = vmul.f32 0.5, %v275_v0 }
 0x2e4   :  { %v277_v2 = vmul.f32 0.125, %v276_v1 }
 0x2e6   :  { %278 = vst.msk [vmem:[#allocation10] sm:$0x1] %vm54_vm8, %v277_v2 }
 0x2e7   :  { %398 = shalt.err (!%p395_p0)
}
 0x2e8   :  { %s399_s24 = scalar_lea.hbm %s510_s3, 16 }
 0x2e9   :  { %p400_p1 = scmp.ne.s32.totalorder %s510_s3, %s399_s24  ;;  %p403_p2 = scmp.lt.u32.totalorder %s399_s24, %s510_s3 }
 0x2eb   :  { %p405_p3 = pnand %p403_p2, %p400_p1 }
 0x2ed   :  { %408 = shalt.err (!%p405_p3)
}
 0x2ee   :  { %288 = dma.vmem_to_hbm [thread:$0]  %s286_s19, 16, %s510_s3, [#allocation6]  }
 0x2ef   :  { %413 = dma.done.wait [#allocation6], 16  }
 0x2f0   :  { %414 = vsyncadd [#allocation6], 4294967280 }
 0x2f1   :  { %292 = vsyncpa [#allocation5], 1 }
 0x2f2   :  { %293 = vsyncpa [#allocation8], 1 }
 0x2f3   :  { %294 = vsyncpa [#allocation6], 1 }

</bundles_post_ra>
